<compile_context>
chip_gen: v5e
topology: v5e:2x2
jax: 0.10.0
libtpu: 0.0.40
codegen_flags: <defaults>
</compile_context>

<pallas_src>
import jax
import jax.numpy as jnp
from jax.experimental import pallas as pl
from jax.experimental.pallas import tpu as pltpu


# ----------------------------------------------------------------------------- kernel
def _attn_kernel(q_ref, kT_ref, w_ref, o_ref):
    # q_ref: (Bb, Tt, Hq)  kT_ref: (Bb, Hk, S)  w_ref: (Hq, Hk)  o_ref: (Bb, Tt, S)
    bb, tt, hq = q_ref.shape
    hk = w_ref.shape[1]

    # ---- q @ W : fold (Bb, Tt) into one MXU row dimension -------------------
    q = q_ref[...]
    if q.dtype != jnp.float32:
        sub = 16 if q.dtype.itemsize == 2 else 32
        if tt % sub != 0 and bb > 1:
            # sublane-unaligned merge in a packed dtype would need a relayout;
            # go through the f32 (8-sublane) layout only in that rare case.
            q = q.astype(jnp.float32)
    q2d = q.reshape(bb * tt, hq).astype(w_ref.dtype)
    qw = jnp.dot(q2d, w_ref[...], preferred_element_type=jnp.float32)
    qw = qw.reshape(bb, tt, hk).astype(kT_ref.dtype)

    # ---- scores: MXU-native [M,K]x[K,N] against the lane-dense key^T ---------
    s = jnp.einsum("btk,bks->bts", qw, kT_ref[...],
                   preferred_element_type=jnp.float32)          # (Bb, Tt, S) f32

    # ---- numerically-stable softmax over the source axis (f32 on the VPU) ----
    m = jnp.max(s, axis=-1, keepdims=True)
    e = jnp.exp(s - m)
    denom = jnp.sum(e, axis=-1, keepdims=True)
    inv = pl.reciprocal(denom, approx=True)   # EUP; rows sum to 1 within ~1e-3
    o_ref[...] = (e * inv).astype(o_ref.dtype)


# --------------------------------------------------------------------------- tiling
def _round_up(x, m):
    return ((x + m - 1) // m) * m


def _sublanes(itemsize):
    # native second-minor tile: 8 for 4-byte, 16 for 2-byte, 32 for 1-byte
    return max(8, 32 // max(int(itemsize), 1))


def _tile_bytes(shape, itemsize):
    """VMEM footprint of a buffer, rounded up to its (sublane, 128-lane) tile."""
    dims = list(shape)
    dims[-1] = _round_up(dims[-1], 128)
    if len(dims) >= 2:
        dims[-2] = _round_up(dims[-2], _sublanes(itemsize))
    n = 1
    for d in dims:
        n *= d
    return n * itemsize


def _vmem_budget():
    """(scoped vmem limit, block-picker budget), generation-aware."""
    try:
        cap = int(pltpu.get_tpu_info().vmem_capacity_bytes)
    except Exception:
        cap = 64 * 1024 * 1024            # conservative (v7x per-core VMEM)
    # ~48 MiB on 128 MiB chips (v5e/v6e), ~40 MiB on 64 MiB chips (v7x)
    vmem_limit = min(48 * 1024 * 1024, int(cap * 0.62))
    return vmem_limit, vmem_limit // 2


def _pick_block_t(t, cap=512):
    """Prefer a divisor of T <= cap that is a multiple of 16; otherwise fall
    back to a fixed 16-multiple tile and a ceil-div grid (last tile partial)."""
    if t <= cap:
        return t
    for d in range(cap, 15, -1):
        if t % d == 0 and d % 16 == 0:
            return d
    return cap


def _step_vmem_bytes(bb, bt, s, hq, hk, in_bytes, out_bytes):
    """Per-step VMEM: double-buffered pipeline buffers + live in-kernel temps,
    each rounded up to its (sublane, 128-lane) tile."""
    buf = 2 * (_tile_bytes((bb, bt, hq), in_bytes)       # q
               + _tile_bytes((bb, hk, s), in_bytes)      # key^T
               + _tile_bytes((hq, hk), in_bytes)         # W
               + _tile_bytes((bb, bt, s), out_bytes))    # output
    tmp = (_tile_bytes((bb * bt, hq), in_bytes)          # q2d merge copy
           + _tile_bytes((bb, bt, hk), 4)                # qw (f32 accumulation)
           + _tile_bytes((bb, bt, hk), in_bytes)         # qw cast for 2nd matmul
           + 2 * _tile_bytes((bb, bt, s), 4))            # scores + exp (f32)
    return buf + tmp


def _pick_block_b(b, bt, s, hq, hk, in_bytes, out_bytes, budget):
    fitting = [d for d in range(b, 0, -1)
               if b % d == 0
               and _step_vmem_bytes(d, bt, s, hq, hk, in_bytes, out_bytes) <= budget]
    if not fitting:
        return 1
    # Prefer >= 2 grid steps on the batch axis so megacore (v7x) shards on B
    # and the two cores fetch disjoint key blocks.
    for d in fitting:
        if 2 * d <= b:
            return d
    return fitting[0]


# --------------------------------------------------------------------------- wrapper
def general_attention(query, key, weights, *, matmul_dtype=jnp.bfloat16,
                      out_dtype=jnp.float32, block_b=None, block_t=None):
    """softmax(query @ weights @ key^T). query [B,T,Hq], key [B,S,Hk] -> [B,T,S].

    out_dtype=jnp.bfloat16 halves the dominant HBM store traffic if downstream
    tolerates bf16 attention weights (default keeps f32 module semantics).
    """
    B, T, Hq = query.shape
    Bk, S, Hk = key.shape
    assert B == Bk and weights.shape == (Hq, Hk)

    if matmul_dtype is not None and query.dtype != matmul_dtype:
        # halves HBM read bytes and uses the bf16 MXU path; softmax stays f32
        query = query.astype(matmul_dtype)
        key = key.astype(matmul_dtype)
        weights = weights.astype(matmul_dtype)

    # Lane-dense key layout: src_len on the 128-lane axis, MXU-native score matmul.
    key_t = jnp.transpose(key, (0, 2, 1))              # (B, Hk, S)

    in_bytes = jnp.dtype(query.dtype).itemsize
    out_bytes = jnp.dtype(out_dtype).itemsize
    vmem_limit, budget = _vmem_budget()

    if block_t is None:
        block_t = _pick_block_t(T)
    if block_b is None:
        block_b = _pick_block_b(B, block_t, S, Hq, Hk, in_bytes, out_bytes, budget)
        # If even a single batch element does not fit, shrink the T tile.
        while (_step_vmem_bytes(block_b, block_t, S, Hq, Hk, in_bytes, out_bytes)
               > budget and block_t > 16):
            block_t = max(16, _round_up(block_t // 2, 16))
            block_b = _pick_block_b(B, block_t, S, Hq, Hk, in_bytes, out_bytes, budget)
    block_t = min(block_t, T)

    grid = (B // block_b, pl.cdiv(T, block_t))

    out = pl.pallas_call(
        _attn_kernel,
        out_shape=jax.ShapeDtypeStruct((B, T, S), out_dtype),
        grid_spec=pltpu.PrefetchScalarGridSpec(
            num_scalar_prefetch=0,
            grid=grid,
            in_specs=[
                pl.BlockSpec((block_b, block_t, Hq), lambda b, t: (b, t, 0)),
                pl.BlockSpec((block_b, Hk, S), lambda b, t: (b, 0, 0)),
                pl.BlockSpec((Hq, Hk), lambda b, t: (0, 0)),
            ],
            out_specs=pl.BlockSpec((block_b, block_t, S),
                                   lambda b, t: (b, t, 0)),
        ),
        compiler_params=pltpu.CompilerParams(
            dimension_semantics=("parallel", "parallel"),
            vmem_limit_bytes=vmem_limit,
        ),
    )(query, key_t, weights)
    return out


# ------------------------------------------------------------------------- references
def _reference(query, key, weights):
    s = jnp.einsum("btq,qk,bsk->bts", query, weights, key)
    return jax.nn.softmax(s, axis=-1)


def _reference_matched(query, key, weights, matmul_dtype):
    """Reference mirroring the kernel's matmul dtypes (for tight tolerances)."""
    q = query.astype(matmul_dtype)
    k = key.astype(matmul_dtype)
    w = weights.astype(matmul_dtype)
    qw = jnp.einsum("btq,qk->btk", q, w, preferred_element_type=jnp.float32)
    qw = qw.astype(matmul_dtype)
    s = jnp.einsum("btk,bsk->bts", qw, k, preferred_element_type=jnp.float32)
    return jax.nn.softmax(s, axis=-1)


if __name__ == "__main__":
    # Shapes consistent with the module: bsz=2, tgt_len=8, src_len=8, hsz=32.
    B, T, S, Hq, Hk = 2, 8, 8, 32, 32

    root = jax.random.PRNGKey(0)
    kq, kk, kw, kq2, kk2, kw2 = jax.random.split(root, 6)

    query = jax.random.normal(kq, (B, T, Hq), dtype=jnp.float32)
    keys = jax.random.normal(kk, (B, S, Hk), dtype=jnp.float32)

    # Deterministic xavier_uniform init for the (Hq, Hk) weight matrix.
    bound = (6.0 / (Hq + Hk)) ** 0.5
    weights = jax.random.uniform(kw, (Hq, Hk), minval=-bound, maxval=bound,
                                 dtype=jnp.float32)

    ref = _reference(query, keys, weights)

    # Default path: bf16 MXU matmuls, f32 softmax, EUP reciprocal.
    out = jax.block_until_ready(general_attention(query, keys, weights))
    assert out.shape == (B, T, S)
    ref_bf16 = _reference_matched(query, keys, weights, jnp.bfloat16)
    assert jnp.allclose(out, ref_bf16, atol=5e-3, rtol=0), \
        float(jnp.max(jnp.abs(out - ref_bf16)))
    assert jnp.allclose(out.sum(axis=-1), 1.0, atol=5e-3)

    # Full-f32 matmul path (tight check against the f32 reference).
    out_f32 = jax.block_until_ready(
        general_attention(query, keys, weights, matmul_dtype=None))
    assert out_f32.shape == (B, T, S)
    assert jnp.allclose(out_f32, ref, atol=5e-3, rtol=0), \
        float(jnp.max(jnp.abs(out_f32 - ref)))

    # A second, rectangular / non-128-multiple shape exercising the unpadded
    # output store path and a non-square W.
    B2, T2, S2, Hq2, Hk2 = 2, 24, 40, 32, 48
    q2 = jax.random.normal(kq2, (B2, T2, Hq2), dtype=jnp.float32)
    k2 = jax.random.normal(kk2, (B2, S2, Hk2), dtype=jnp.float32)
    b2 = (6.0 / (Hq2 + Hk2)) ** 0.5
    w2 = jax.random.uniform(kw2, (Hq2, Hk2), minval=-b2, maxval=b2,
                            dtype=jnp.float32)
    out2 = jax.block_until_ready(
        general_attention(q2, k2, w2, matmul_dtype=None))
    ref2 = _reference(q2, k2, w2)
    assert out2.shape == (B2, T2, S2)
    assert jnp.allclose(out2, ref2, atol=5e-3, rtol=0), \
        float(jnp.max(jnp.abs(out2 - ref2)))

    print("KERNEL_OK")
</pallas_src>

<mosaic_0001>
module attributes {stable_mosaic.version = 11 : i64} {
  func.func @_attn_kernel(%arg0: i32, %arg1: i32, %arg2: memref<1x8x32xbf16, #tpu.memory_space<vmem>>, %arg3: memref<1x32x8xbf16, #tpu.memory_space<vmem>>, %arg4: memref<32x32xbf16, #tpu.memory_space<vmem>>, %arg5: memref<1x8x8xf32, #tpu.memory_space<vmem>>) attributes {dimension_semantics = [#tpu.dimension_semantics<parallel>, #tpu.dimension_semantics<parallel>], iteration_bounds = array<i64: 2, 1>, scalar_prefetch = 0 : i64, scratch_operands = 0 : i64, tpu.core_type = #tpu.core_type<tc>, window_params = [{transform_indices = @transform_0, window_bounds = array<i64: 1, 8, 32>}, {transform_indices = @transform_1, window_bounds = array<i64: 1, 32, 8>}, {pipeline_mode = #tpu.pipeline_mode<synchronous>, transform_indices = @transform_2, window_bounds = array<i64: 32, 32>}, {transform_indices = @transform_3, window_bounds = array<i64: 1, 8, 8>}]} {
    %c0 = arith.constant 0 : index
    %c0_0 = arith.constant 0 : index
    %c0_1 = arith.constant 0 : index
    %0 = vector.load %arg2[%c0, %c0_0, %c0_1] : memref<1x8x32xbf16, #tpu.memory_space<vmem>>, vector<1x8x32xbf16>
    %1 = vector.shape_cast %0 : vector<1x8x32xbf16> to vector<8x32xbf16>
    %c0_2 = arith.constant 0 : index
    %c0_3 = arith.constant 0 : index
    %2 = vector.load %arg4[%c0_2, %c0_3] : memref<32x32xbf16, #tpu.memory_space<vmem>>, vector<32x32xbf16>
    %cst = arith.constant dense<0.000000e+00> : vector<8x32xf32>
    %3 = tpu.matmul %1, %2, %cst {dimension_numbers = #tpu.dot_dimension_numbers<[1], [0], [0], [1], [0, 0, 1, 1], [], []>} : vector<8x32xbf16>, vector<32x32xbf16>, vector<8x32xf32> -> vector<8x32xf32>
    %4 = vector.shape_cast %3 : vector<8x32xf32> to vector<1x8x32xf32>
    %5 = arith.truncf %4 : vector<1x8x32xf32> to vector<1x8x32xbf16>
    %c0_4 = arith.constant 0 : index
    %c0_5 = arith.constant 0 : index
    %c0_6 = arith.constant 0 : index
    %6 = vector.load %arg3[%c0_4, %c0_5, %c0_6] : memref<1x32x8xbf16, #tpu.memory_space<vmem>>, vector<1x32x8xbf16>
    "tpu.trace_start"() <{level = 10 : i32, message = "btk,bks->bts"}> : () -> ()
    %cst_7 = arith.constant dense<0.000000e+00> : vector<1x8x8xf32>
    %7 = tpu.matmul %5, %6, %cst_7 {dimension_numbers = #tpu.dot_dimension_numbers<[2], [1], [1], [2], [0, 0, 0, 1, 1, 2], [0], [0]>} : vector<1x8x32xbf16>, vector<1x32x8xbf16>, vector<1x8x8xf32> -> vector<1x8x8xf32>
    "tpu.trace_stop"() : () -> ()
    %cst_8 = arith.constant dense<0xFF800000> : vector<1x8xf32>
    %8 = vector.multi_reduction <maximumf>, %7, %cst_8 [2] : vector<1x8x8xf32> to vector<1x8xf32>
    %9 = vector.shape_cast %8 : vector<1x8xf32> to vector<1x8x1xf32>
    %10 = vector.broadcast %9 : vector<1x8x1xf32> to vector<1x8x8xf32>
    %11 = arith.subf %7, %10 : vector<1x8x8xf32>
    %12 = math.exp %11 : vector<1x8x8xf32>
    %cst_9 = arith.constant dense<0.000000e+00> : vector<1x8xf32>
    %13 = vector.multi_reduction <add>, %12, %cst_9 [2] : vector<1x8x8xf32> to vector<1x8xf32>
    %14 = vector.shape_cast %13 : vector<1x8xf32> to vector<1x8x1xf32>
    %15 = tpu.reciprocal %14 {approx = true} : vector<1x8x1xf32> -> vector<1x8x1xf32>
    %16 = vector.broadcast %15 : vector<1x8x1xf32> to vector<1x8x8xf32>
    %17 = arith.mulf %12, %16 : vector<1x8x8xf32>
    %c0_10 = arith.constant 0 : index
    %c0_11 = arith.constant 0 : index
    %c0_12 = arith.constant 0 : index
    %18 = vector.load %arg5[%c0_10, %c0_11, %c0_12] : memref<1x8x8xf32, #tpu.memory_space<vmem>>, vector<1x8x8xf32>
    tpu.vector_store %arg5[%c0_10, %c0_11, %c0_12], %17 {strides = array<i32>} : memref<1x8x8xf32, #tpu.memory_space<vmem>>, vector<1x8x8xf32>,
    return
  }
  func.func @transform_0(%arg0: i32, %arg1: i32) -> (i32, i32, i32) {
    %c0_i32 = arith.constant 0 : i32
    %c0_i32_0 = arith.constant 0 : i32
    return %arg0, %arg1, %c0_i32 : i32, i32, i32
  }
  func.func @transform_1(%arg0: i32, %arg1: i32) -> (i32, i32, i32) {
    %c0_i32 = arith.constant 0 : i32
    %c0_i32_0 = arith.constant 0 : i32
    %c0_i32_1 = arith.constant 0 : i32
    return %arg0, %c0_i32, %c0_i32_0 : i32, i32, i32
  }
  func.func @transform_2(%arg0: i32, %arg1: i32) -> (i32, i32) {
    %c0_i32 = arith.constant 0 : i32
    %c0_i32_0 = arith.constant 0 : i32
    %c0_i32_1 = arith.constant 0 : i32
    return %c0_i32, %c0_i32_0 : i32, i32
  }
  func.func @transform_3(%arg0: i32, %arg1: i32) -> (i32, i32, i32) {
    %c0_i32 = arith.constant 0 : i32
    %c0_i32_0 = arith.constant 0 : i32
    return %arg0, %arg1, %c0_i32 : i32, i32, i32
  }
}

</mosaic_0001>

<bundles_post_ra>
// kernel: tpu_custom_call.1
= control target key start
LH: loop header
LB: loop body
LE: loop exit
PB: predicated region body
PF: predicated region fallthrough
CT: control target
= control target key end

     0   :  { %8 = vsyncpa [#allocation3], 0  ;;  %s696_s0 = inlined_call_operand.vmem [shape: bf16[2,8,32], index: 0, kind: input, shape index: {}]   ;;  %s697_s1 = inlined_call_operand.vmem [shape: bf16[2,32,8], index: 1, kind: input, shape index: {}]   ;;  %s698_s2 = inlined_call_operand.vmem [shape: bf16[32,32], index: 2, kind: input, shape index: {}]   ;;  %s699_s3 = inlined_call_operand.hbm [shape: f32[2,8,8], index: 3, kind: output, shape index: {}]  }
   0x1   :  { %10 = vsyncpa [#allocation3 + $0x1], 0  ;;  %s587_s12 = smov 0   ;;  %s589_s13 = smov 0  }
   0x2   :  { %s591_s14 = smov 0   ;;  %s593_s15 = smov 0  }
   0x3   :  { %s595_s16 = smov 0   ;;  %s597_s17 = smov 0  }
   0x4 LB: > { %s392_s18 = sadd.s32 4294967295, %s565_s17   ;;  %s393_s19 = sadd.s32 4294967294, %s565_s17   ;;  %s565_s17 = sphi %s597_s17, %s16_s17   ;;  %s561_s16 = sphi %s595_s16, %s706_s16   ;;  %s557_s15 = sphi %s593_s15, %s705_s15   ;;  %s553_s14 = sphi %s591_s14, %s704_s14   ;;  %s549_s13 = sphi %s589_s13, %s703_s13   ;;  %s545_s12 = sphi %s587_s12, %s702_s12  }
   0x5   : > { %s28_s20 = sadd.s32 1, %s561_s16  ;;  %s112_s21 = sadd.s32 1, %s553_s14 }
   0x6   : > { %p30_p0 = scmp.ge.s32.totalorder %s28_s20, 2  ;;  %p122_p1 = scmp.ne.s32.totalorder %s553_s14, %s549_s13 }
   0x7   : > { %p123_p2 = scmp.eq.s32.totalorder %s392_s18, 1  ;;  %p128_p3 = scmp.ne.s32.totalorder %s549_s13, %s545_s12 }
   0x8   : > { %s708_s20 = smov (%p30_p0, %s28_s20), 0  ;;  %p129_p5 = scmp.eq.s32.totalorder %s393_s19, 1 }
   0x9   : > { %p627_p4 = por %p123_p2, %p122_p1  ;;  %s107_s23 = ssub.s32 %s561_s16, %s708_s20 }
   0xa   : > { %p396_p6 = scmp.ge.s32.totalorder %s565_s17, 1  ;;  %p110_p7 = scmp.eq.s32.totalorder %s107_s23, 0 }
   0xb   : > { %p634_p8 = por %p129_p5, %p128_p3  ;;  %p168_p9 = scmp.lt.s32.totalorder %s565_s17, 3 }
   0xc   : > { %s640_s25 = scalar_select %p110_p7, %s553_s14, %s112_s21  }
   0xd   : > { %p169_p10 = pnand %p396_p6, %p168_p9 }
   0xe   : > { %p199_p11 = scmp.lt.s32.totalorder (!%p169_p10), %s557_s15, 1  ;;  %s196_s18 = sand.u32 (!%p169_p10), 1, %s549_s13  }
   0xf   : > { %172 = sbr.rel (%p169_p10) target bundleno = 539 (0x21b), region = 32  ;;  %s397_s19 = sshll.u32 (!%p169_p10), %s196_s18, 3 }
  0x10   : > { %s420_s21 = sshll.u32 (!%p169_p10), %s557_s15, 3  ;;  %s198_s28 = scalar_lea.vmem (!%p169_p10), [#allocation2], %s397_s19 }
  0x11   : > { %s304_s27 = scalar_lea.hbm (!%p169_p10), %s699_s3, %s420_s21  ;;  %s306_s29 = sshll.u32 (!%p169_p10), %s198_s28, 4  ;;  %s307_s29 = int_to_ptr.vmem [resolvable:$true] %s306_s29 }
  0x14   : > { %v425_v0 = vld [vmem:[%s698_s2 + $0x8] sm:$0xff]  ;;  %v424_v1 = vld [vmem:[%s698_s2] sm:$0xff]  ;;  %s200_s30 = scalar_select %p199_p11, %s557_s15, 1  ;;  %vm229_vm0 = vcmask 261120   ;;  %vm279_vm1 = vcmask 64512  }
  0x15   : > { %239 = vmatpush.bf16.msra.mxu0 %v425_v0 }
  0x16   : > { %s398_s4 = sshll.u32 %s200_s30, 2  ;;  %s423_s5 = sshll.u32 %s200_s30, 4 }
  0x17   : > { %s205_s8 = scalar_lea.vmem %s696_s0, %s398_s4  ;;  %s210_s11 = scalar_lea.vmem %s697_s1, %s423_s5 }
  0x18   : > { %v212_v2 = vld [vmem:[%s205_s8] sm:$0xf]  ;;  %v427_v3 = vld [vmem:[%s210_s11 + $0x8] sm:$0xff]  ;;  %s308_s30 = sshll.u32 %s304_s27, 4  ;;  %s293_s4 = scalar_lea.sflag [#allocation3], %s196_s18  ;;  %s309_s30 = int_to_ptr.hbm [resolvable:$true] %s308_s30 }
  0x19   : > { %240 = vmatpush.bf16.msra.mxu0 %v424_v1  ;;  %272 = vmatpush.bf16.msra.mxu1 %v427_v3  ;;  %v426_v4 = vld [vmem:[%s210_s11] sm:$0xff]  ;;  %s501_s5 = sshra.s32 %s309_s30, 4  ;;  %s507_s8 = scalar_lea.hbm %s699_s3, 16  ;;  %s502_s5 = int_to_ptr.hbm [resolvable:$true] %s501_s5 }
  0x1a   : > { %s503_s15 = scalar_lea.hbm %s502_s5, 8  ;;  %p508_p1 = scmp.lt.s32.totalorder %s502_s5, %s699_s3 }
  0x1b   : > { %p504_p12 = scmp.ne.s32.totalorder %s502_s5, %s503_s15  ;;  %p509_p2 = scmp.lt.s32.totalorder %s507_s8, %s503_s15 }
  0x1c   : > { %409 = vmatmul.msk.bf16.vlgmr.msra.gmra.mxu0 %vm229_vm0, %v212_v2 }
  0x1d   : > { %273 = vmatpush.bf16.msra.mxu1 %v426_v4  ;;  %p505_p13 = pnand %p504_p12, %p627_p4  ;;  %p510_p3 = por %p509_p2, %p508_p1 }
  0x1f   : > { %p506_p0 = pneg %p505_p13 }
  0x21   : > { %p511_p5 = pnand %p510_p3, %p506_p0 }
  0x99   : > { %v242_v5 = vpop.f32.mrf.mxu0 }
  0x9a   : > { %v246_v6 = vpack.c.bf16 %v242_v5, %v242_v5 }
  0x9c   : > { %418 = vmatmul.msk.bf16.vlgmr.msra.gmra.mxu1 %vm229_vm0, %v246_v6 }
  0xa1   : > { %v244_v7 = vpop.f32.mrf.mxu0 }
 0x119   : > { %v275_v8 = vpop.f32.mrf.mxu1 }
 0x11a   : > { %v280_v9 = vsel %vm279_vm1, %v275_v8, -inf }
 0x11b   : > { %281 = vmax.xlane.f32.xlu0 %v280_v9 }
 0x121   : > { %v277_v10 = vpop.f32.mrf.mxu1 }
 0x18e   : > { %v282_v11 = vpop.xlane.xlu0 %281 }
 0x18f   : > { %v283_v12 = vsub.f32 %v275_v8, %v282_v11 }
 0x191   : > { %v284_v13 = vmul.f32 1.442695, %v283_v12 }
 0x193   : > { %483 = vpow2.f32 %v284_v13 }
 0x199   : > { %v484_v14 = vpop.eup %483 }
 0x19a   : > { %v286_v15 = vsel %vm279_vm1, %v484_v14, 0.0 }
 0x19b   : > { %287 = vadd.xlane.f32.xlu0 %v286_v15 }
 0x20e   : > { %v288_v16 = vpop.xlane.xlu0 %287 }
 0x20f   : > { %485 = vrcp.f32 %v288_v16 }
 0x215   : > { %v486_v17 = vpop.eup %485 }
 0x216   : > { %v290_v18 = vmul.f32 %v486_v17, %v484_v14 }
 0x218   : > { %291 = vst.msk [vmem:[%s198_s28] sm:$0xff] %vm279_vm1, %v290_v18 }
 0x219   : > { %514 = shalt.err (!%p511_p5)
}
 0x21a   : > { %428 = dma.vmem_to_hbm [thread:$0]  (%p627_p4), %s307_s29, 128, %s309_s30, %s293_s4  }
 0x21b PF: > { %p434_p6 = scmp.ge.s32.totalorder %s565_s17, 2  ;;  %s320_s11 = sand.u32 1, %s545_s12  }
 0x21c   : > { %s321_s18 = scalar_lea.sflag [#allocation3], %s320_s11 }
 0x21d   : > { %p431_p7 = pnand %p434_p6, %p634_p8 }
 0x21f   : > { %p432_p9 = pneg %p431_p7 }
 0x221   : > { %540 = dma.done.wait (%p432_p9), %s321_s18, 128  }
 0x222   : > { %542 = vsyncadd (%p432_p9), %s321_s18, 4294967168  ;;  %s16_s17 = sadd.s32 1, %s565_s17   ;;  %s702_s12 = smov %s549_s13 }
 0x223   : > { %p13_p10 = scmp.ge.s32.totalorder %s16_s17, 4   ;;  %s703_s13 = smov %s553_s14 }
 0x224   : > { %s704_s14 = smov %s640_s25  ;;  %s705_s15 = smov %s561_s16 }
 0x225   : > { %s706_s16 = smov %s708_s20  ;;  %15 = sbr.rel (!%p13_p10) target bundleno = 4 (0x4), region = 70 }
 0x22a   :  { %327 = vsyncpa [#allocation3], 1 }
 0x22b   :  { %329 = vsyncpa [#allocation3 + $0x1], 1 }

</bundles_post_ra>
